<compile_context>
chip_gen: v7x
topology: tpu7x:2x2x1
jax: 0.10.0
libtpu: 0.0.40
codegen_flags: <defaults>
</compile_context>

<pallas_src>
import functools
from functools import partial

import jax
import jax.numpy as jnp
from jax.experimental import pallas as pl
from jax.experimental.pallas import tpu as pltpu

_LANE = 128
_MAX_LANES = 2048  # widest lane-dense slab we form


# ---------------------------------------------------------------------------
# Generation-dependent block target / scoped-VMEM limit.
# ---------------------------------------------------------------------------
@functools.lru_cache(maxsize=1)
def _block_and_vmem_bytes():
    try:
        vmem_phys = pltpu.get_tpu_info().vmem_capacity_bytes
    except Exception:  # pragma: no cover - conservative fallback off-TPU/older jax
        vmem_phys = 128 << 20
    if vmem_phys <= (64 << 20):
        # v7x: 64 MiB per-TC VMEM, 3.2 TB/s HBM -> bigger blocks, tighter limit.
        return 8 << 20, 48 << 20
    # v5e / v6e: 128 MiB physical VMEM.
    return 4 << 20, 64 << 20


# ---------------------------------------------------------------------------
# Pallas kernel: dx = -lambda * g  (elementwise, HBM-bound; neg_lam is static)
# ---------------------------------------------------------------------------
def _neg_scale_kernel(g_ref, o_ref, *, neg_lam):
    g = g_ref[...]
    o_ref[...] = (g * jnp.asarray(neg_lam, dtype=g.dtype)).astype(o_ref.dtype)


# ---------------------------------------------------------------------------
# Tiling helpers
# ---------------------------------------------------------------------------
def _choose_tile_rows(rows, lanes, itemsize, target_bytes):
    """Row tile: multiple of the dtype's min sublane count, ~target_bytes,
    and (when possible) at least 2 grid steps so v7x megacore engages."""
    min_sub = 8 * (4 // itemsize)  # f32 -> 8, bf16 -> 16, int8/fp8 -> 32
    if rows <= min_sub:
        return rows  # full-dim block (allowed by tiling rules)
    tile = target_bytes // (lanes * itemsize)
    tile = max(min_sub, (tile // min_sub) * min_sub)
    tile = min(tile, rows)
    tile = max(min_sub, (tile // min_sub) * min_sub)
    # Guarantee >= 2 grid steps so the "parallel" axis uses both v7x TCs.
    if pl.cdiv(rows, tile) < 2:
        tile = max(min_sub, ((tile // 2) // min_sub) * min_sub)
    return tile


def _neg_scale_pallas(neg_lam, flat):
    """flat: 1-D array, length a (nonzero) multiple of 128. Returns -lam*flat."""
    m = flat.size
    lanes = _LANE
    for cand in range(min(_MAX_LANES, m), _LANE - 1, -_LANE):
        if m % cand == 0:
            lanes = cand
            break
    g2d = flat.reshape(m // lanes, lanes)
    rows = g2d.shape[0]
    itemsize = jnp.dtype(g2d.dtype).itemsize
    block_bytes, vmem_limit = _block_and_vmem_bytes()
    tile_r = _choose_tile_rows(rows, lanes, itemsize, block_bytes)

    dx2d = pl.pallas_call(
        partial(_neg_scale_kernel, neg_lam=neg_lam),
        out_shape=jax.ShapeDtypeStruct((rows, lanes), g2d.dtype),
        grid_spec=pl.GridSpec(
            grid=(pl.cdiv(rows, tile_r),),
            in_specs=[pl.BlockSpec((tile_r, lanes), lambda i: (i, 0))],
            out_specs=pl.BlockSpec((tile_r, lanes), lambda i: (i, 0)),
        ),
        compiler_params=pltpu.CompilerParams(
            dimension_semantics=("parallel",),  # shard row tiles across v7x TCs
            vmem_limit_bytes=vmem_limit,
        ),
        cost_estimate=pl.CostEstimate(
            flops=rows * lanes,
            transcendentals=0,
            bytes_accessed=2 * rows * lanes * itemsize,
        ),
        input_output_aliases={0: 0},  # reuse the cotangent buffer for dx
    )(g2d)
    return dx2d.reshape(-1)


def _neg_scale(lambda_, g):
    """dx = -lambda_ * g for any shape; Pallas on the 128-aligned bulk."""
    neg_lam = -float(lambda_)
    n = g.size
    if n == 0:
        return g
    flat = g.reshape(-1)
    n_main = (n // _LANE) * _LANE
    if n_main == 0:
        # Tiny tensor (< 128 elems): a single XLA multiply beats any kernel.
        return (flat * jnp.asarray(neg_lam, dtype=g.dtype)).reshape(g.shape)
    dx_main = _neg_scale_pallas(neg_lam, flat[:n_main])
    if n_main == n:
        return dx_main.reshape(g.shape)
    # <=127-element tail handled by XLA; avoids pad + full-array slice passes.
    tail = flat[n_main:] * jnp.asarray(neg_lam, dtype=g.dtype)
    return jnp.concatenate([dx_main, tail]).reshape(g.shape)


# ---------------------------------------------------------------------------
# GradientReversalLayer: identity forward (no kernel), Pallas backward.
# lambda_ is non-differentiable/static, matching the PyTorch Function which
# returns None for its gradient.
# ---------------------------------------------------------------------------
# TODO(synk): if lambda_ ever needs to be a traced JAX scalar, drop
# nondiff_argnums and return a zero cotangent for it instead.
@partial(jax.custom_vjp, nondiff_argnums=(1,))
def gradient_reversal_layer(x, lambda_):
    return x  # forward is identity -> zero HBM traffic, zero kernel launches


def _grl_fwd(x, lambda_):
    return x, None


def _grl_bwd(lambda_, _residuals, g):
    return (_neg_scale(lambda_, g),)


gradient_reversal_layer.defvjp(_grl_fwd, _grl_bwd)


if __name__ == "__main__":
    key = jax.random.PRNGKey(0)
    x = jax.random.normal(key, (2, 4, 16, 16), dtype=jnp.float32)  # NCHW
    lambda_ = 0.5

    # Forward pass: identity.
    y = gradient_reversal_layer(x, lambda_)
    jax.block_until_ready(y)
    assert y.shape == x.shape and y.dtype == x.dtype
    assert jnp.allclose(y, x), "forward must be identity"

    # Backward via jax.grad: d/dx sum(GRL(x)) == -lambda * ones.
    grad_x = jax.grad(lambda xx: jnp.sum(gradient_reversal_layer(xx, lambda_)))(x)
    jax.block_until_ready(grad_x)
    assert jnp.allclose(grad_x, -lambda_ * jnp.ones_like(x)), "backward must be -lambda*g"

    # Backward via jax.vjp with a non-trivial cotangent (exercises the Pallas kernel).
    g = jax.random.normal(jax.random.PRNGKey(1), x.shape, dtype=jnp.float32)
    _, vjp_fn = jax.vjp(lambda xx: gradient_reversal_layer(xx, lambda_), x)
    (dx,) = vjp_fn(g)
    jax.block_until_ready(dx)
    assert jnp.allclose(dx, -lambda_ * g, rtol=1e-6, atol=1e-6), "vjp mismatch"

    # Non-128-aligned size: exercises the cheap XLA-tail path.
    x_odd = jax.random.normal(jax.random.PRNGKey(2), (3, 5, 7, 5), dtype=jnp.float32)
    g_odd = jax.random.normal(jax.random.PRNGKey(3), x_odd.shape, dtype=jnp.float32)
    _, vjp_odd = jax.vjp(lambda xx: gradient_reversal_layer(xx, lambda_), x_odd)
    (dx_odd,) = vjp_odd(g_odd)
    jax.block_until_ready(dx_odd)
    assert jnp.allclose(dx_odd, -lambda_ * g_odd, rtol=1e-6, atol=1e-6), "ragged vjp mismatch"

    print("KERNEL_OK")
</pallas_src>

<mosaic_0001>
module attributes {stable_mosaic.version = 11 : i64} {
  func.func @_neg_scale_kernel(%arg0: i32, %arg1: memref<1x2048xf32, #tpu.memory_space<vmem>>, %arg2: memref<1x2048xf32, #tpu.memory_space<vmem>>) attributes {dimension_semantics = [#tpu.dimension_semantics<parallel>], iteration_bounds = array<i64: 1>, scalar_prefetch = 0 : i64, scratch_operands = 0 : i64, tpu.core_type = #tpu.core_type<tc>, window_params = [{transform_indices = @transform_0, window_bounds = array<i64: 1, 2048>}, {transform_indices = @transform_1, window_bounds = array<i64: 1, 2048>}]} {
    %c0 = arith.constant 0 : index
    %c0_0 = arith.constant 0 : index
    %0 = vector.load %arg1[%c0, %c0_0] : memref<1x2048xf32, #tpu.memory_space<vmem>>, vector<1x2048xf32>
    %cst = arith.constant -5.000000e-01 : f32
    %1 = vector.broadcast %cst : f32 to vector<1x2048xf32>
    %2 = arith.mulf %0, %1 : vector<1x2048xf32>
    %c0_1 = arith.constant 0 : index
    %c0_2 = arith.constant 0 : index
    %3 = vector.load %arg2[%c0_1, %c0_2] : memref<1x2048xf32, #tpu.memory_space<vmem>>, vector<1x2048xf32>
    tpu.vector_store %arg2[%c0_1, %c0_2], %2 {strides = array<i32>} : memref<1x2048xf32, #tpu.memory_space<vmem>>, vector<1x2048xf32>,
    return
  }
  func.func @transform_0(%arg0: i32) -> (i32, i32) {
    %c0_i32 = arith.constant 0 : i32
    %c0_i32_0 = arith.constant 0 : i32
    return %arg0, %c0_i32 : i32, i32
  }
  func.func @transform_1(%arg0: i32) -> (i32, i32) {
    %c0_i32 = arith.constant 0 : i32
    %c0_i32_0 = arith.constant 0 : i32
    return %arg0, %c0_i32 : i32, i32
  }
}

</mosaic_0001>

<bundles_post_ra>
// kernel: tpu_custom_call.1
= control target key start
LH: loop header
LB: loop body
LE: loop exit
PB: predicated region body
PF: predicated region fallthrough
CT: control target
= control target key end

     0   :  { %6 = vsyncpa [#allocation3], 0  ;;  %s128_s0 = inlined_call_operand.hbm [shape: f32[1,2048], index: 0, kind: input, shape index: {}, may-alias: {0,1}]   ;;  %s129_s1 = inlined_call_operand.hbm [shape: f32[1,2048], index: 1, kind: output, shape index: {}, may-alias: {0,1}]  }
   0x1   :  { %7 = vsyncpa [#allocation4], 0  ;;  %s92_s6 = smov [#allocation2]   ;;  %s44_s10 = scalar_lea.hbm %s128_s0, 256 }
   0x2   :  { %s14_s7 = sshll.u32 %s92_s6, 4  ;;  %p45_p0 = scmp.ne.s32.totalorder %s128_s0, %s44_s10  ;;  %s15_s7 = int_to_ptr.vmem [resolvable:$true] %s14_s7 }
   0x3   :  { %p48_p1 = scmp.lt.u32.totalorder %s44_s10, %s128_s0 }
   0x5   :  { %p50_p2 = pnand %p48_p1, %p45_p0 }
   0x7   :  { %53 = shalt.err (!%p50_p2)
}
   0x8   :  { %s54_s15 = scalar_lea.vmem %s15_s7, 256  ;;  %p59_p4 = scmp.lt.s32.totalorder %s15_s7, %s15_s7 }
   0x9   :  { %p55_p3 = scmp.ne.s32.totalorder %s15_s7, %s54_s15  ;;  %p60_p5 = scmp.lt.s32.totalorder %s54_s15, %s54_s15 }
   0xb   :  { %p61_p6 = por %p60_p5, %p59_p4 }
   0xd   :  { %p62_p7 = pnand %p61_p6, %p55_p3 }
   0xf   :  { %65 = shalt.err (!%p62_p7)
}
  0x10   :  { %17 = dma.hbm_to_vmem [thread:$0]  %s128_s0, 256, %s15_s7, [#allocation3]  }
  0x11   :  { %88 = dma.done.wait [#allocation3], 256  }
  0x12   :  { %89 = vsyncadd [#allocation3], 4294967040  ;;  %s93_s18 = smov [#allocation5]   ;;  %v21_v0 = vld [vmem:[#allocation2] sm:$0xff]  ;;  %v22_v1 = vld [vmem:[#allocation2 + $0x8] sm:$0xff] }
  0x13   :  { %s33_s19 = sshll.u32 %s93_s18, 4  ;;  %v23_v2 = vmul.f32 -0.5, %v21_v0  ;;  %v24_v3 = vmul.f32 -0.5, %v22_v1  ;;  %s34_s19 = int_to_ptr.vmem [resolvable:$true] %s33_s19 }
  0x14   :  { %s66_s20 = scalar_lea.vmem %s34_s19, 256  ;;  %p71_p9 = scmp.lt.s32.totalorder %s34_s19, %s34_s19 }
  0x15   :  { %25 = vst [vmem:[#allocation5] sm:$0xff] %v23_v2  ;;  %26 = vst [vmem:[#allocation5 + $0x8] sm:$0xff] %v24_v3  ;;  %p67_p8 = scmp.ne.s32.totalorder %s34_s19, %s66_s20  ;;  %p72_p10 = scmp.lt.s32.totalorder %s66_s20, %s66_s20 }
  0x17   :  { %p73_p11 = por %p72_p10, %p71_p9 }
  0x19   :  { %p74_p12 = pnand %p73_p11, %p67_p8 }
  0x1b   :  { %77 = shalt.err (!%p74_p12)
}
  0x1c   :  { %s78_s22 = scalar_lea.hbm %s129_s1, 256 }
  0x1d   :  { %p79_p13 = scmp.ne.s32.totalorder %s129_s1, %s78_s22  ;;  %p82_p0 = scmp.lt.u32.totalorder %s78_s22, %s129_s1 }
  0x1f   :  { %p84_p1 = pnand %p82_p0, %p79_p13 }
  0x21   :  { %87 = shalt.err (!%p84_p1)
}
  0x22   :  { %36 = dma.vmem_to_hbm [thread:$0]  %s34_s19, 256, %s129_s1, [#allocation4]  }
  0x23   :  { %90 = dma.done.wait [#allocation4], 256  }
  0x24   :  { %91 = vsyncadd [#allocation4], 4294967040 }
  0x25   :  { %40 = vsyncpa [#allocation3], 1 }
  0x26   :  { %41 = vsyncpa [#allocation4], 1 }

</bundles_post_ra>
